<compile_context>
chip_gen: v5e
topology: v5e:2x2
jax: 0.10.0
libtpu: 0.0.40
codegen_flags: <defaults>
</compile_context>

<pallas_src>
import jax
import jax.numpy as jnp
from jax.experimental import pallas as pl
from jax.experimental.pallas import tpu as pltpu


def _round_up(x, m):
    return ((x + m - 1) // m) * m


def _hidden_kernel(x_ref, w_ref, hid_ref):
    # x_ref:   [B, tv]  tile of the dense input
    # w_ref:   [tv, E]  tile of W^T (canonical orientation)
    # hid_ref: [B, E]   f32 accumulator, VMEM-resident across the whole grid
    @pl.when(pl.program_id(0) == 0)
    def _():
        hid_ref[...] = jnp.zeros_like(hid_ref)

    hid_ref[...] += jnp.dot(
        x_ref[...], w_ref[...], preferred_element_type=jnp.float32
    )


def _output_kernel(hid_ref, wt_ref, out_ref):
    # hid_ref: [B, E]   (f32, resident — same block every grid step)
    # wt_ref:  [E, tv]  tile of WT^T
    # out_ref: [B, tv]  lane-dense output slab (unmasked vst)
    h = hid_ref[...].astype(wt_ref.dtype)
    out_ref[...] = jnp.dot(
        h, wt_ref[...], preferred_element_type=jnp.float32
    ).astype(out_ref.dtype)


def word2vec_forward(x, w, wt, *, compute_dtype=jnp.float32, block_v=1024):
    """Forward of the Word2Vec module.

    x:  [B, V]  dense input (one-hot rows in the tutorial; any dense batch works)
    w:  [E, V]  PyTorch W.weight layout
    wt: [V, E]  PyTorch WT.weight layout
    returns [B, V] float32
    """
    B, V = x.shape
    E = w.shape[0]
    assert w.shape == (E, V) and wt.shape == (V, E)

    # One-time layout plumbing in the wrapper (free relative to streaming cost):
    # canonical [M,K]@[K,N] orientation for both matmuls, optional bf16 cast.
    x_c = x.astype(compute_dtype)        # [B, V]
    w_t = w.T.astype(compute_dtype)      # [V, E]
    wt_t = wt.T.astype(compute_dtype)    # [E, V]

    # Lane-dense V tiling (multiple of 128); zero-pad the ragged tail.
    tv = min(block_v, _round_up(V, 128))
    v_pad = _round_up(V, tv)
    if v_pad != V:
        x_c = jnp.pad(x_c, ((0, 0), (0, v_pad - V)))     # zero cols -> zero contribution
        w_t = jnp.pad(w_t, ((0, v_pad - V), (0, 0)))
        wt_t = jnp.pad(wt_t, ((0, 0), (0, v_pad - V)))   # extra out cols sliced off below
    n_v = v_pad // tv

    # Stage 1: hidden = X @ W^T  (sequential reduction over V tiles).
    hidden = pl.pallas_call(
        _hidden_kernel,
        out_shape=jax.ShapeDtypeStruct((B, E), jnp.float32),
        grid=(n_v,),
        in_specs=[
            pl.BlockSpec((B, tv), lambda k: (0, k)),
            pl.BlockSpec((tv, E), lambda k: (k, 0)),
        ],
        out_specs=pl.BlockSpec((B, E), lambda k: (0, 0)),
        compiler_params=pltpu.CompilerParams(
            dimension_semantics=("arbitrary",),
        ),
    )(x_c, w_t)

    # Stage 2: out = hidden @ WT^T  (independent lane-dense output slabs).
    out = pl.pallas_call(
        _output_kernel,
        out_shape=jax.ShapeDtypeStruct((B, v_pad), jnp.float32),
        grid=(n_v,),
        in_specs=[
            pl.BlockSpec((B, E), lambda j: (0, 0)),
            pl.BlockSpec((E, tv), lambda j: (0, j)),
        ],
        out_specs=pl.BlockSpec((B, tv), lambda j: (0, j)),
        compiler_params=pltpu.CompilerParams(
            dimension_semantics=("parallel",),
        ),
    )(hidden, wt_t)

    return out[:, :V]


if __name__ == "__main__":
    # Small, tile-friendly synthetic shapes (same as the tutorial's toy setup).
    batch = 8
    voc_size = 128
    embedding_size = 32

    key = jax.random.PRNGKey(0)
    k_idx, k_w, k_wt = jax.random.split(key, 3)

    # Deterministic parameter init (synthetic, not a checkpoint), PyTorch layouts.
    W = jax.random.normal(k_w, (embedding_size, voc_size), dtype=jnp.float32) * 0.1
    WT = jax.random.normal(k_wt, (voc_size, embedding_size), dtype=jnp.float32) * 0.1

    # One-hot input batch, as in the Word2Vec tutorial (random_batch builds one-hots).
    idx = jax.random.randint(k_idx, (batch,), 0, voc_size)
    X = jax.nn.one_hot(idx, voc_size, dtype=jnp.float32)  # [batch, voc_size]

    # Reference in plain JAX (same math as the PyTorch forward).
    ref = (X @ W.T) @ WT.T

    # Exact f32 path — preserves the module's numerics.
    out_f32 = jax.block_until_ready(
        word2vec_forward(X, W, WT, compute_dtype=jnp.float32)
    )
    assert out_f32.shape == (batch, voc_size)
    assert jnp.allclose(out_f32, ref, atol=1e-5, rtol=1e-5)

    # bf16-streamed path — halves HBM weight traffic (memory-bound regime);
    # looser tolerance per bf16 mantissa.
    out_bf16 = jax.block_until_ready(
        word2vec_forward(X, W, WT, compute_dtype=jnp.bfloat16)
    )
    assert out_bf16.shape == (batch, voc_size)
    assert jnp.allclose(out_bf16, ref, atol=2e-2, rtol=2e-2)

    print("KERNEL_OK")
</pallas_src>

<mosaic_0001>
module attributes {stable_mosaic.version = 11 : i64} {
  func.func @_hidden_kernel(%arg0: i32, %arg1: memref<8x128xf32, #tpu.memory_space<vmem>>, %arg2: memref<128x32xf32, #tpu.memory_space<vmem>>, %arg3: memref<8x32xf32, #tpu.memory_space<vmem>>) attributes {dimension_semantics = [#tpu.dimension_semantics<arbitrary>], iteration_bounds = array<i64: 1>, scalar_prefetch = 0 : i64, scratch_operands = 0 : i64, tpu.core_type = #tpu.core_type<tc>, window_params = [{transform_indices = @transform_0, window_bounds = array<i64: 8, 128>}, {transform_indices = @transform_1, window_bounds = array<i64: 128, 32>}, {pipeline_mode = #tpu.pipeline_mode<synchronous>, transform_indices = @transform_2, window_bounds = array<i64: 8, 32>}]} {
    %c0_i32 = arith.constant 0 : i32
    %0 = arith.cmpi eq, %arg0, %c0_i32 : i32
    %1 = arith.extui %0 : i1 to i32
    %c0_i32_0 = arith.constant 0 : i32
    %2 = arith.cmpi ne, %1, %c0_i32_0 : i32
    scf.if %2 {
      %cst_8 = arith.constant 0.000000e+00 : f32
      %9 = vector.broadcast %cst_8 : f32 to vector<8x32xf32>
      %c0_9 = arith.constant 0 : index
      %c0_10 = arith.constant 0 : index
      %10 = vector.load %arg3[%c0_9, %c0_10] : memref<8x32xf32, #tpu.memory_space<vmem>>, vector<8x32xf32>
      tpu.vector_store %arg3[%c0_9, %c0_10], %9 {strides = array<i32>} : memref<8x32xf32, #tpu.memory_space<vmem>>, vector<8x32xf32>,
    } else {
    }
    %c0 = arith.constant 0 : index
    %c0_1 = arith.constant 0 : index
    %3 = vector.load %arg3[%c0, %c0_1] : memref<8x32xf32, #tpu.memory_space<vmem>>, vector<8x32xf32>
    %c0_2 = arith.constant 0 : index
    %c0_3 = arith.constant 0 : index
    %4 = vector.load %arg1[%c0_2, %c0_3] : memref<8x128xf32, #tpu.memory_space<vmem>>, vector<8x128xf32>
    %c0_4 = arith.constant 0 : index
    %c0_5 = arith.constant 0 : index
    %5 = vector.load %arg2[%c0_4, %c0_5] : memref<128x32xf32, #tpu.memory_space<vmem>>, vector<128x32xf32>
    %cst = arith.constant dense<0.000000e+00> : vector<8x32xf32>
    %6 = tpu.matmul %4, %5, %cst {dimension_numbers = #tpu.dot_dimension_numbers<[1], [0], [0], [1], [0, 0, 1, 1], [], []>} : vector<8x128xf32>, vector<128x32xf32>, vector<8x32xf32> -> vector<8x32xf32>
    %7 = arith.addf %3, %6 : vector<8x32xf32>
    %c0_6 = arith.constant 0 : index
    %c0_7 = arith.constant 0 : index
    %8 = vector.load %arg3[%c0_6, %c0_7] : memref<8x32xf32, #tpu.memory_space<vmem>>, vector<8x32xf32>
    tpu.vector_store %arg3[%c0_6, %c0_7], %7 {strides = array<i32>} : memref<8x32xf32, #tpu.memory_space<vmem>>, vector<8x32xf32>,
    return
  }
  func.func @transform_0(%arg0: i32) -> (i32, i32) {
    %c0_i32 = arith.constant 0 : i32
    %c0_i32_0 = arith.constant 0 : i32
    return %c0_i32, %arg0 : i32, i32
  }
  func.func @transform_1(%arg0: i32) -> (i32, i32) {
    %c0_i32 = arith.constant 0 : i32
    %c0_i32_0 = arith.constant 0 : i32
    return %arg0, %c0_i32 : i32, i32
  }
  func.func @transform_2(%arg0: i32) -> (i32, i32) {
    %c0_i32 = arith.constant 0 : i32
    %c0_i32_0 = arith.constant 0 : i32
    %c0_i32_1 = arith.constant 0 : i32
    return %c0_i32, %c0_i32_0 : i32, i32
  }
}

</mosaic_0001>

<bundles_post_ra>
// kernel: tpu_custom_call.1
= control target key start
LH: loop header
LB: loop body
LE: loop exit
PB: predicated region body
PF: predicated region fallthrough
CT: control target
= control target key end

     0   :  { %vm16_vm0 = vcmask 261120   ;;  %v103_v2 = vmov 0.0   ;;  %s176_s0 = inlined_call_operand.vmem [shape: f32[8,128], index: 0, kind: input, shape index: {}]   ;;  %s177_s1 = inlined_call_operand.vmem [shape: f32[128,32], index: 1, kind: input, shape index: {}]   ;;  %s178_s2 = inlined_call_operand.hbm [shape: f32[8,32], index: 2, kind: output, shape index: {}]  }
   0x1   :  { %v35_v0 = vld [vmem:[%s177_s1 + $0x78] sm:$0xff]  ;;  %v34_v1 = vld [vmem:[%s177_s1 + $0x70] sm:$0xff]  ;;  %17 = vst.msk [vmem:[#allocation2] sm:$0xff] %vm16_vm0, %v103_v2  ;;  %v33_v3 = vld [vmem:[%s177_s1 + $0x68] sm:$0xff] }
   0x2   :  { %36 = vmatpush.msra.mxu0 %v35_v0  ;;  %v32_v4 = vld [vmem:[%s177_s1 + $0x60] sm:$0xff] }
   0x4   :  { %37 = vmatpush.msra.mxu0 %v34_v1 }
   0x6   :  { %38 = vmatpush.msra.mxu0 %v33_v3 }
   0x7   :  { %7 = vsyncpa [#allocation3], 0  ;;  %v31_v5 = vld [vmem:[%s177_s1 + $0x58] sm:$0xff]  ;;  %v30_v6 = vld [vmem:[%s177_s1 + $0x50] sm:$0xff]  ;;  %s104_s15 = smov [#allocation2]   ;;  %s66_s19 = sshll.u32 %s178_s2, 4  ;;  %s67_s19 = int_to_ptr.hbm [resolvable:$true] %s66_s19 }
   0x8   :  { %39 = vmatpush.msra.mxu0 %v32_v4  ;;  %v29_v7 = vld [vmem:[%s177_s1 + $0x48] sm:$0xff]  ;;  %v28_v8 = vld [vmem:[%s177_s1 + $0x40] sm:$0xff]  ;;  %v27_v9 = vld [vmem:[%s177_s1 + $0x38] sm:$0xff]  ;;  %s64_s16 = sshll.u32 %s104_s15, 4  ;;  %s65_s16 = int_to_ptr.vmem [resolvable:$true] %s64_s16 }
   0x9   :  { %v26_v10 = vld [vmem:[%s177_s1 + $0x30] sm:$0xff]  ;;  %v25_v11 = vld [vmem:[%s177_s1 + $0x28] sm:$0xff]  ;;  %v24_v12 = vld [vmem:[%s177_s1 + $0x20] sm:$0xff] }
   0xa   :  { %40 = vmatpush.msra.mxu0 %v31_v5  ;;  %v23_v13 = vld [vmem:[%s177_s1 + $0x18] sm:$0xff]  ;;  %v22_v14 = vld [vmem:[%s177_s1 + $0x10] sm:$0xff]  ;;  %v21_v15 = vld [vmem:[%s177_s1 + $0x8] sm:$0xff] }
   0xb   :  { %v20_v16 = vld [vmem:[%s177_s1] sm:$0xff] }
   0xc   :  { %41 = vmatpush.msra.mxu0 %v30_v6  ;;  %v19_v17 = vld [vmem:[%s176_s0] sm:$0xff] }
   0xd   :  { %v18_v18 = vld [vmem:[#allocation2] sm:$0xff] }
   0xe   :  { %42 = vmatpush.msra.mxu0 %v29_v7 }
  0x10   :  { %43 = vmatpush.msra.mxu0 %v28_v8 }
  0x12   :  { %44 = vmatpush.msra.mxu0 %v27_v9 }
  0x14   :  { %45 = vmatpush.msra.mxu0 %v26_v10 }
  0x16   :  { %46 = vmatpush.msra.mxu0 %v25_v11 }
  0x18   :  { %47 = vmatpush.msra.mxu0 %v24_v12 }
  0x1a   :  { %48 = vmatpush.msra.mxu0 %v23_v13 }
  0x1c   :  { %49 = vmatpush.msra.mxu0 %v22_v14 }
  0x1e   :  { %50 = vmatpush.msra.mxu0 %v21_v15 }
  0x20   :  { %51 = vmatpush.msra.mxu0 %v20_v16 }
  0x21   :  { %52 = vmatmul.f32.vlgmr.msra.gmra.mxu0 %v19_v17 }
  0x9e   :  { %v53_v19 = vpop.f32.mrf.mxu0 }
  0x9f   :  { %v56_v20 = vadd.f32 %v53_v19, %v18_v18 }
  0xa1   :  { %58 = vst.msk [vmem:[#allocation2] sm:$0xff] %vm16_vm0, %v56_v20 }
  0xa2   :  { %69 = dma.vmem_to_hbm [thread:$0]  %s65_s16, 128, %s67_s19, [#allocation3]  }
  0xa3   :  { %101 = dma.done.wait [#allocation3], 128  }
  0xa4   :  { %102 = vsyncadd [#allocation3], 4294967168 }
  0xa5   :  { %74 = vsyncpa [#allocation3], 1 }

</bundles_post_ra>
